<compile_context>
chip_gen: v5e
topology: v5e:2x2
jax: 0.10.0
libtpu: 0.0.40
codegen_flags: <defaults>
</compile_context>

<pallas_src>
import math

import jax
import jax.numpy as jnp
from jax.experimental import pallas as pl
from jax.experimental.pallas import tpu as pltpu

# Per-step VMEM block budget (double-buffered in/out + accumulator). Kept well
# under v7x's 64 MiB per-TC VMEM; v5e/v6e have 128 MiB so this is always safe.
_VMEM_BLOCK_BUDGET = 40 << 20


def _round_up(x, m):
    return ((x + m - 1) // m) * m


def _divisor_tiles(dim, cap):
    """128-multiples dividing `dim`, up to `cap`, descending. dim % 128 == 0."""
    cands = [t for t in range(128, min(dim, cap) + 1, 128) if dim % t == 0]
    return sorted(cands or [128], reverse=True)


def _block_footprint(tm, tn, tk, a_bytes, b_bytes, o_bytes, *, use_acc, has_bias):
    """Double-buffered VMEM bytes for one grid step."""
    f = 2 * tm * tk * a_bytes + 2 * tk * tn * b_bytes + 2 * tm * tn * o_bytes
    if use_acc:
        f += tm * tn * 4
    if has_bias:
        f += 2 * tn * 4
    return f


def _select_tiles(M, K, N, a_bytes, b_bytes, o_bytes, *,
                  use_acc, has_bias, full_n, budget):
    # Output-column tiles: for adj @ support we prefer the full output width so
    # the dominant HBM stream (adj) is read from HBM exactly once.
    tn_cands = _divisor_tiles(N, 512)
    if full_n:
        tn_cands = [N] + [t for t in tn_cands if t != N]
    # Row tiles: large, but keep >= 2 row blocks (tm <= M//2 for M >= 256) so
    # the "parallel" i axis can be split across v7x's two TensorCores.
    tm_cap = 512 if M < 256 else min(512, M // 2)
    tm_cands = _divisor_tiles(M, tm_cap)
    # Reduction tiles: as large as the budget allows (fewer pipeline steps,
    # fewer accumulator round-trips).
    tk_cands = _divisor_tiles(K, 1024)

    for tn in tn_cands:
        for tm in tm_cands:
            for tk in tk_cands:
                if _block_footprint(tm, tn, tk, a_bytes, b_bytes, o_bytes,
                                    use_acc=use_acc, has_bias=has_bias) <= budget:
                    return tm, tn, tk
    return tm_cands[-1], tn_cands[-1], tk_cands[-1]


# ----------------------------- kernel bodies ------------------------------ #

def _mm_kernel_accum_out(a_ref, b_ref, o_ref):
    """f32 output: accumulate directly into the k-resident output block."""
    @pl.when(pl.program_id(2) == 0)
    def _():
        o_ref[...] = jnp.zeros_like(o_ref)

    o_ref[...] += jnp.dot(a_ref[...], b_ref[...],
                          preferred_element_type=jnp.float32)


def _mm_bias_kernel_accum_out(a_ref, b_ref, bias_ref, o_ref):
    k = pl.program_id(2)

    @pl.when(k == 0)
    def _():
        o_ref[...] = jnp.zeros_like(o_ref)

    o_ref[...] += jnp.dot(a_ref[...], b_ref[...],
                          preferred_element_type=jnp.float32)

    @pl.when(k == pl.num_programs(2) - 1)
    def _():
        # bias_ref is (1, tn): broadcasts over the tm rows.
        o_ref[...] = o_ref[...] + bias_ref[...]


def _mm_kernel_scratch(a_ref, b_ref, o_ref, acc_ref):
    """Narrow (bf16) output: keep an f32 scratch accumulator, cast at the end."""
    k = pl.program_id(2)

    @pl.when(k == 0)
    def _():
        acc_ref[...] = jnp.zeros_like(acc_ref)

    acc_ref[...] += jnp.dot(a_ref[...], b_ref[...],
                            preferred_element_type=jnp.float32)

    @pl.when(k == pl.num_programs(2) - 1)
    def _():
        o_ref[...] = acc_ref[...].astype(o_ref.dtype)


def _mm_bias_kernel_scratch(a_ref, b_ref, bias_ref, o_ref, acc_ref):
    k = pl.program_id(2)

    @pl.when(k == 0)
    def _():
        acc_ref[...] = jnp.zeros_like(acc_ref)

    acc_ref[...] += jnp.dot(a_ref[...], b_ref[...],
                            preferred_element_type=jnp.float32)

    @pl.when(k == pl.num_programs(2) - 1)
    def _():
        o_ref[...] = (acc_ref[...] + bias_ref[...]).astype(o_ref.dtype)


# ----------------------------- tiled matmul -------------------------------- #

def _tiled_matmul_padded(a, b, bias=None, *, out_dtype=None, full_n=False):
    """Tiled matmul a @ b (+ bias). All dims must be multiples of 128.

    a: (M, K), b: (K, N), bias: (1, N) float32 or None.
    """
    M, K = a.shape
    K2, N = b.shape
    assert K == K2, (a.shape, b.shape)
    out_dtype = out_dtype or a.dtype

    a_bytes = jnp.dtype(a.dtype).itemsize
    b_bytes = jnp.dtype(b.dtype).itemsize
    o_bytes = jnp.dtype(out_dtype).itemsize
    # f32 outputs accumulate in-place in the output block; narrower outputs
    # need a separate f32 scratch accumulator.
    use_scratch = jnp.dtype(out_dtype) != jnp.dtype(jnp.float32)
    has_bias = bias is not None

    tm, tn, tk = _select_tiles(M, K, N, a_bytes, b_bytes, o_bytes,
                               use_acc=use_scratch, has_bias=has_bias,
                               full_n=full_n, budget=_VMEM_BLOCK_BUDGET)
    grid = (M // tm, N // tn, K // tk)

    a_spec = pl.BlockSpec((tm, tk), lambda i, j, k: (i, k))
    b_spec = pl.BlockSpec((tk, tn), lambda i, j, k: (k, j))
    out_spec = pl.BlockSpec((tm, tn), lambda i, j, k: (i, j))

    footprint = _block_footprint(tm, tn, tk, a_bytes, b_bytes, o_bytes,
                                 use_acc=use_scratch, has_bias=has_bias)
    vmem_limit = int(max(32 << 20, footprint + (8 << 20)))

    # Count re-reads: A is streamed once per j block, B once per i block.
    bytes_accessed = (grid[1] * M * K * a_bytes
                      + grid[0] * K * N * b_bytes
                      + M * N * o_bytes)
    if has_bias:
        bytes_accessed += N * 4
    cost = pl.CostEstimate(flops=2 * M * N * K, transcendentals=0,
                           bytes_accessed=bytes_accessed)

    compiler_params = pltpu.CompilerParams(
        dimension_semantics=("parallel", "parallel", "arbitrary"),
        vmem_limit_bytes=vmem_limit)

    scratch = [pltpu.VMEM((tm, tn), jnp.float32)] if use_scratch else []
    out_shape = jax.ShapeDtypeStruct((M, N), out_dtype)

    if has_bias:
        bias_spec = pl.BlockSpec((1, tn), lambda i, j, k: (0, j))
        in_specs = [a_spec, b_spec, bias_spec]
        args = (a, b, bias)
        kernel = _mm_bias_kernel_scratch if use_scratch else _mm_bias_kernel_accum_out
    else:
        in_specs = [a_spec, b_spec]
        args = (a, b)
        kernel = _mm_kernel_scratch if use_scratch else _mm_kernel_accum_out

    return pl.pallas_call(
        kernel,
        out_shape=out_shape,
        grid_spec=pltpu.PrefetchScalarGridSpec(
            num_scalar_prefetch=0,
            grid=grid,
            in_specs=in_specs,
            out_specs=out_spec,
            scratch_shapes=scratch),
        compiler_params=compiler_params,
        cost_estimate=cost,
    )(*args)


# ------------------------------- GCN layer --------------------------------- #

def graph_convolution(x, adj, weight, bias=None, *, compute_dtype=jnp.bfloat16):
    """Pallas GCN layer: adj @ (x @ weight) + bias.

    x:      (N, F_in)   float32
    adj:    (N, N)      float32 (dense; torch.spmm semantics on a dense adj)
    weight: (F_in, F_out)
    bias:   (F_out,) or None

    Inputs are cast to `compute_dtype` (bf16 by default) at the kernel
    boundary with float32 MXU accumulation; the result is float32.
    """
    n, f_in = x.shape
    f_out = weight.shape[1]

    n_p = _round_up(n, 128)
    f_in_p = _round_up(f_in, 128)
    f_out_p = _round_up(f_out, 128)

    # Tiny graphs: padding to 128-multiples would inflate MXU work > 4x and
    # pallas_call fixed overhead dominates — use a plain fused XLA dot.
    padded_flops = n_p * f_in_p * f_out_p + n_p * n_p * f_out_p
    orig_flops = max(1, n * f_in * f_out + n * n * f_out)
    if padded_flops > 4 * orig_flops:
        support = jnp.dot(x, weight.astype(x.dtype),
                          preferred_element_type=jnp.float32)
        out = jnp.dot(adj.astype(x.dtype), support,
                      preferred_element_type=jnp.float32)
        if bias is not None:
            out = out + bias[None, :].astype(out.dtype)
        return out.astype(x.dtype)

    cdt = compute_dtype

    # Cast then pad: the pad (when needed at all) runs over the half-width
    # bf16 array, and zero-padded rows/cols contribute exact zeros.
    x_p = x.astype(cdt)
    if n_p != n or f_in_p != f_in:
        x_p = jnp.pad(x_p, ((0, n_p - n), (0, f_in_p - f_in)))
    w_p = weight.astype(cdt)
    if f_in_p != f_in or f_out_p != f_out:
        w_p = jnp.pad(w_p, ((0, f_in_p - f_in), (0, f_out_p - f_out)))
    adj_p = adj.astype(cdt)
    if n_p != n:
        adj_p = jnp.pad(adj_p, ((0, n_p - n), (0, n_p - n)))

    # Stage 1: support = X @ W (computed once, stored in bf16 to halve the
    # HBM write + re-read feeding stage 2).
    support_p = _tiled_matmul_padded(x_p, w_p, out_dtype=cdt)

    # Stage 2: out = adj @ support (+ bias fused into the final k step).
    # full_n=True forces tn = f_out_p when it fits, so adj is read exactly once.
    b_p = None
    if bias is not None:
        b_p = bias.reshape(1, f_out).astype(jnp.float32)
        if f_out_p != f_out:
            b_p = jnp.pad(b_p, ((0, 0), (0, f_out_p - f_out)))
    out_p = _tiled_matmul_padded(adj_p, support_p, bias=b_p,
                                 out_dtype=jnp.float32, full_n=True)

    return out_p[:n, :f_out].astype(x.dtype)


def init_gcn_params(key, in_features, out_features, bias=True):
    """Deterministic init mirroring GraphConvolution.reset_parameters()."""
    stdv = 1.0 / math.sqrt(out_features)
    k_w, k_b = jax.random.split(key)
    weight = jax.random.uniform(
        k_w, (in_features, out_features), minval=-stdv, maxval=stdv,
        dtype=jnp.float32)
    b = None
    if bias:
        b = jax.random.uniform(
            k_b, (out_features,), minval=-stdv, maxval=stdv,
            dtype=jnp.float32)
    return weight, b


if __name__ == "__main__":
    key = jax.random.PRNGKey(0)
    k_x, k_adj, k_par, k_x2, k_adj2, k_par2 = jax.random.split(key, 6)

    # ---- Pallas path: 128-aligned, modest graph sizes ----
    N, F_IN, F_OUT = 256, 128, 128
    x = jax.random.normal(k_x, (N, F_IN), dtype=jnp.float32)
    raw = jax.random.uniform(k_adj, (N, N), dtype=jnp.float32)
    adj = (raw + raw.T) * 0.5 + jnp.eye(N, dtype=jnp.float32)
    adj = adj / jnp.sum(adj, axis=1, keepdims=True)
    weight, bias = init_gcn_params(k_par, F_IN, F_OUT, bias=True)

    out = jax.block_until_ready(graph_convolution(x, adj, weight, bias))
    assert out.shape == (N, F_OUT)

    # Reference with matching bf16 input rounding (f32 accumulation).
    xb = x.astype(jnp.bfloat16)
    ab = adj.astype(jnp.bfloat16)
    wb = weight.astype(jnp.bfloat16)
    sup_ref = jnp.dot(xb, wb, preferred_element_type=jnp.float32
                      ).astype(jnp.bfloat16)
    ref_nb = jnp.dot(ab, sup_ref, preferred_element_type=jnp.float32)
    ref_b = ref_nb + bias[None, :]
    assert jnp.allclose(out, ref_b, atol=2e-3, rtol=2e-3), \
        float(jnp.max(jnp.abs(out - ref_b)))

    # Loose check against the exact f32 reference (bf16 quantization only).
    ref_f32 = adj @ (x @ weight) + bias[None, :]
    assert jnp.allclose(out, ref_f32, atol=5e-2, rtol=5e-2)

    # No-bias kernel variant.
    out_nb = jax.block_until_ready(graph_convolution(x, adj, weight, None))
    assert jnp.allclose(out_nb, ref_nb, atol=2e-3, rtol=2e-3)

    # ---- Tiny-graph fallback (plain XLA dot; padding would inflate >4x) ----
    n2, fi2, fo2 = 8, 16, 32
    x2 = jax.random.normal(k_x2, (n2, fi2), dtype=jnp.float32)
    raw2 = jax.random.uniform(k_adj2, (n2, n2), dtype=jnp.float32)
    adj2 = (raw2 + raw2.T) * 0.5 + jnp.eye(n2, dtype=jnp.float32)
    adj2 = adj2 / jnp.sum(adj2, axis=1, keepdims=True)
    w2, b2 = init_gcn_params(k_par2, fi2, fo2, bias=True)
    out2 = jax.block_until_ready(graph_convolution(x2, adj2, w2, b2))
    ref2 = adj2 @ (x2 @ w2) + b2[None, :]
    assert out2.shape == (n2, fo2)
    assert jnp.allclose(out2, ref2, atol=1e-4, rtol=1e-4)

    print("KERNEL_OK")
</pallas_src>

<mosaic_0001>
module attributes {stable_mosaic.version = 11 : i64} {
  func.func @_mm_kernel_scratch(%arg0: i32, %arg1: i32, %arg2: i32, %arg3: memref<128x128xbf16, #tpu.memory_space<vmem>>, %arg4: memref<128x128xbf16, #tpu.memory_space<vmem>>, %arg5: memref<128x128xbf16, #tpu.memory_space<vmem>>, %arg6: memref<128x128xf32, #tpu.memory_space<vmem>>) attributes {dimension_semantics = [#tpu.dimension_semantics<parallel>, #tpu.dimension_semantics<parallel>, #tpu.dimension_semantics<arbitrary>], iteration_bounds = array<i64: 2, 1, 1>, scalar_prefetch = 0 : i64, scratch_operands = 1 : i64, tpu.core_type = #tpu.core_type<tc>, window_params = [{transform_indices = @transform_0, window_bounds = array<i64: 128, 128>}, {transform_indices = @transform_1, window_bounds = array<i64: 128, 128>}, {transform_indices = @transform_2, window_bounds = array<i64: 128, 128>}]} {
    %c0_i32 = arith.constant 0 : i32
    %0 = arith.cmpi eq, %arg2, %c0_i32 : i32
    %1 = arith.extui %0 : i1 to i32
    %c0_i32_0 = arith.constant 0 : i32
    %2 = arith.cmpi ne, %1, %c0_i32_0 : i32
    scf.if %2 {
      %cst_10 = arith.constant 0.000000e+00 : f32
      %12 = vector.broadcast %cst_10 : f32 to vector<128x128xf32>
      %c0_11 = arith.constant 0 : index
      %c0_12 = arith.constant 0 : index
      %13 = vector.load %arg6[%c0_11, %c0_12] : memref<128x128xf32, #tpu.memory_space<vmem>>, vector<128x128xf32>
      tpu.vector_store %arg6[%c0_11, %c0_12], %12 {strides = array<i32>} : memref<128x128xf32, #tpu.memory_space<vmem>>, vector<128x128xf32>,
    } else {
    }
    %c0 = arith.constant 0 : index
    %c0_1 = arith.constant 0 : index
    %3 = vector.load %arg6[%c0, %c0_1] : memref<128x128xf32, #tpu.memory_space<vmem>>, vector<128x128xf32>
    %c0_2 = arith.constant 0 : index
    %c0_3 = arith.constant 0 : index
    %4 = vector.load %arg3[%c0_2, %c0_3] : memref<128x128xbf16, #tpu.memory_space<vmem>>, vector<128x128xbf16>
    %c0_4 = arith.constant 0 : index
    %c0_5 = arith.constant 0 : index
    %5 = vector.load %arg4[%c0_4, %c0_5] : memref<128x128xbf16, #tpu.memory_space<vmem>>, vector<128x128xbf16>
    %cst = arith.constant dense<0.000000e+00> : vector<128x128xf32>
    %6 = tpu.matmul %4, %5, %cst {dimension_numbers = #tpu.dot_dimension_numbers<[1], [0], [0], [1], [0, 0, 1, 1], [], []>} : vector<128x128xbf16>, vector<128x128xbf16>, vector<128x128xf32> -> vector<128x128xf32>
    %7 = arith.addf %3, %6 : vector<128x128xf32>
    %c0_6 = arith.constant 0 : index
    %c0_7 = arith.constant 0 : index
    %8 = vector.load %arg6[%c0_6, %c0_7] : memref<128x128xf32, #tpu.memory_space<vmem>>, vector<128x128xf32>
    tpu.vector_store %arg6[%c0_6, %c0_7], %7 {strides = array<i32>} : memref<128x128xf32, #tpu.memory_space<vmem>>, vector<128x128xf32>,
    %c0_i32_8 = arith.constant 0 : i32
    %9 = arith.cmpi eq, %arg2, %c0_i32_8 : i32
    %10 = arith.extui %9 : i1 to i32
    %c0_i32_9 = arith.constant 0 : i32
    %11 = arith.cmpi ne, %10, %c0_i32_9 : i32
    scf.if %11 {
      %c0_10 = arith.constant 0 : index
      %c0_11 = arith.constant 0 : index
      %12 = vector.load %arg6[%c0_10, %c0_11] : memref<128x128xf32, #tpu.memory_space<vmem>>, vector<128x128xf32>
      %13 = arith.truncf %12 : vector<128x128xf32> to vector<128x128xbf16>
      %c0_12 = arith.constant 0 : index
      %c0_13 = arith.constant 0 : index
      %14 = vector.load %arg5[%c0_12, %c0_13] : memref<128x128xbf16, #tpu.memory_space<vmem>>, vector<128x128xbf16>
      tpu.vector_store %arg5[%c0_12, %c0_13], %13 {strides = array<i32>} : memref<128x128xbf16, #tpu.memory_space<vmem>>, vector<128x128xbf16>,
    } else {
    }
    return
  }
  func.func @transform_0(%arg0: i32, %arg1: i32, %arg2: i32) -> (i32, i32) {
    %c0_i32 = arith.constant 0 : i32
    return %arg0, %arg2 : i32, i32
  }
  func.func @transform_1(%arg0: i32, %arg1: i32, %arg2: i32) -> (i32, i32) {
    %c0_i32 = arith.constant 0 : i32
    return %arg2, %arg1 : i32, i32
  }
  func.func @transform_2(%arg0: i32, %arg1: i32, %arg2: i32) -> (i32, i32) {
    %c0_i32 = arith.constant 0 : i32
    return %arg0, %arg1 : i32, i32
  }
}

</mosaic_0001>

<bundles_post_ra>
// kernel: tpu_custom_call.1
= control target key start
LH: loop header
LB: loop body
LE: loop exit
PB: predicated region body
PF: predicated region fallthrough
CT: control target
= control target key end

     0   :  { %7 = vsyncpa [#allocation4], 0  ;;  %s1218_s0 = inlined_call_operand.hbm [shape: bf16[256,128], index: 0, kind: input, shape index: {}]   ;;  %s1219_s1 = inlined_call_operand.hbm [shape: bf16[128,128], index: 1, kind: input, shape index: {}]   ;;  %s1220_s2 = inlined_call_operand.hbm [shape: bf16[256,128], index: 2, kind: output, shape index: {}]  }
   0x1   :  { %9 = vsyncpa [#allocation4 + $0x1], 0 }
   0x2   :  { %10 = vsyncpa [#allocation7], 0 }
   0x3   :  { %11 = vsyncpa [#allocation5], 0 }
   0x4   :  { %13 = vsyncpa [#allocation5 + $0x1], 0  ;;  %s1049_s9 = smov 0   ;;  %s1051_s10 = smov 0  }
   0x5   :  { %s1053_s11 = smov 0   ;;  %s1055_s12 = smov 0  }
   0x6   :  { %s1057_s13 = smov 0   ;;  %s1059_s14 = smov 0  }
   0x7 LB: > { %s634_s15 = sadd.s32 4294967295, %s1027_s14   ;;  %s635_s16 = sadd.s32 4294967294, %s1027_s14   ;;  %s1027_s14 = sphi %s1059_s14, %s19_s14   ;;  %s1023_s13 = sphi %s1057_s13, %s1232_s13   ;;  %s1019_s12 = sphi %s1055_s12, %s1231_s12   ;;  %s1015_s11 = sphi %s1053_s11, %s1230_s11   ;;  %s1011_s10 = sphi %s1051_s10, %s1229_s10   ;;  %s1007_s9 = sphi %s1049_s9, %s1228_s9  }
   0x8   : > { %p60_p0 = scmp.ne.s32.totalorder %s1011_s10, %s1007_s9  ;;  %p1083_p1 = scmp.eq.s32.totalorder %s634_s15, 0 }
   0x9   : > { %p1087_p2 = scmp.eq.s32.totalorder %s634_s15, 1  ;;  %p120_p3 = scmp.eq.s32.totalorder %s635_s16, 1 }
   0xa   : > { %p1093_p4 = por %p1083_p1, %p60_p0  ;;  %p636_p5 = scmp.ge.s32.totalorder %s1027_s14, 1 }
   0xb   : > { %p1098_p6 = por %p120_p3, %p60_p0  ;;  %p127_p7 = scmp.lt.s32.totalorder %s1027_s14, 3 }
   0xc   : > { %s142_s23 = sshll.u32 %s1219_s1, 4  ;;  %s1029_s25 = smov [#allocation6]   ;;  %s143_s23 = int_to_ptr.hbm [resolvable:$true] %s142_s23 }
   0xd   : > { %p1106_p8 = pnand %p636_p5, %p127_p7  ;;  %s144_s26 = sshll.u32 %s1029_s25, 4  ;;  %s145_s26 = int_to_ptr.vmem [resolvable:$true] %s144_s26 }
   0xe   : > { %p638_p11 = scmp.ge.s32.totalorder %s1027_s14, 2  ;;  %s1030_s27 = smov 64  }
   0xf   : > { %p812_p9 = pneg %p1106_p8  ;;  %s1031_s28 = smov 4  }
  0x10   : > { %s38_s29 = sadd.s32 1, %s1023_s13  ;;  %s47_s30 = sadd.s32 1, %s1015_s11 }
  0x11   : > { %p813_p10 = pnand %p812_p9, %p1083_p1  ;;  %p40_p12 = scmp.ge.s32.totalorder %s38_s29, 2 }
  0x12   : > { %p54_p13 = scmp.ne.s32.totalorder %s1015_s11, %s1011_s10  ;;  %p55_p0 = scmp.eq.s32.totalorder %s1027_s14, 0 }
  0x13   : > { %815 = dma.hbm_to_vmem [thread:$0]  (!%p813_p10), %s143_s23, 1024, %s145_s26, [#allocation7], %s1030_s27, %s1030_s27, %s1031_s28  }
  0x14   : > { %s1234_s29 = smov (%p40_p12, %s38_s29), 0  ;;  %p1125_p3 = por %p55_p0, %p54_p13 }
  0x15   : > { %p1131_p5 = por %p1087_p2, %p54_p13  ;;  %s42_s5 = ssub.s32 %s1023_s13, %s1234_s29 }
  0x16   : > { %p825_p7 = scmp.lt.s32.totalorder %s1027_s14, 2  ;;  %p45_p9 = scmp.eq.s32.totalorder %s42_s5, 0 }
  0x17   : > { %s158_s6 = sand.u32 1, %s1015_s11   ;;  %s715_s15 = sshll.u32 %s1023_s13, 6 }
  0x18   : > { %s639_s7 = sshll.u32 %s158_s6, 6  ;;  %s168_s22 = scalar_lea.hbm %s1218_s0, %s715_s15 }
  0x19   : > { %s1140_s8 = scalar_select %p45_p9, %s1015_s11, %s47_s30  }
  0x1a   : > { %s162_s23 = scalar_lea.vmem [#allocation3], %s639_s7  ;;  %s169_s18 = sshll.u32 %s168_s22, 4  ;;  %s170_s18 = int_to_ptr.hbm [resolvable:$true] %s169_s18 }
  0x1b   : > { %s171_s25 = sshll.u32 %s162_s23, 4  ;;  %p817_p2 = pnand %p825_p7, %p1125_p3  ;;  %s172_s25 = int_to_ptr.vmem [resolvable:$true] %s171_s25 }
  0x1c   : > { %s159_s26 = scalar_lea.sflag [#allocation4], %s158_s6  ;;  %183 = sbr.rel (%p1106_p8) target bundleno = 232 (0xe8), region = 28 }
  0x1d   : > { %819 = dma.hbm_to_vmem [thread:$0]  (!%p817_p2), %s170_s18, 1024, %s172_s25, %s159_s26, %s1030_s27, %s1030_s27, %s1031_s28  }
  0x1e   : > { %s1154_s30 = sand.u32 (!%p1106_p8), 1, %s1011_s10  }
  0x1f   : > { %s643_s5 = sshll.u32 (!%p1106_p8), %s1154_s30, 6  ;;  %s186_s7 = scalar_lea.sflag (!%p1106_p8), [#allocation4], %s1154_s30 }
  0x20   : > { %s1160_s3 = scalar_lea.vmem (!%p1106_p8), [#allocation3], %s643_s5 }
  0x21   : > { %994 = dma.done.wait (%p1093_p4), %s186_s7, 1024  }
  0x22   : > { %996 = vsyncadd (%p1093_p4), %s186_s7, 4294966272 }
  0x23   : > { %998 = dma.done.wait (%p1083_p1), [#allocation7], 1024  }
  0x24   : > { %1000 = vsyncadd (%p1083_p1), [#allocation7], 4294966272  ;;  %v731_v0 = vld [vmem:[#allocation6 + $0x38] sm:$0xff]  ;;  %v730_v1 = vld [vmem:[#allocation6 + $0x30] sm:$0xff]  ;;  %s215_s17 = scalar_lea.vmem [#allocation8], %s643_s5  ;;  %s732_s19 = sshll.u32 %s1019_s12, 6 }
  0x25   : > { %383 = vmatpush.bf16.msra.mxu0 %v731_v0  ;;  %780 = vmatpush.bf16.msra.mxu1 %v731_v0  ;;  %v729_v2 = vld [vmem:[#allocation6 + $0x28] sm:$0xff]  ;;  %v728_v3 = vld [vmem:[#allocation6 + $0x20] sm:$0xff]  ;;  %v727_v4 = vld [vmem:[#allocation6 + $0x18] sm:$0xff]  ;;  %s528_s28 = scalar_lea.hbm %s1220_s2, %s732_s19  ;;  %s529_s6 = sshll.u32 %s215_s17, 4  ;;  %s530_s6 = int_to_ptr.vmem [resolvable:$true] %s529_s6 }
  0x26   : > { %781 = vmatpush.bf16.msra.mxu2 %v731_v0  ;;  %782 = vmatpush.bf16.msra.mxu3 %v731_v0  ;;  %v726_v5 = vld [vmem:[#allocation6 + $0x10] sm:$0xff]  ;;  %v725_v6 = vld [vmem:[#allocation6 + $0x8] sm:$0xff]  ;;  %v724_v7 = vld [vmem:[#allocation6] sm:$0xff]  ;;  %s531_s15 = sshll.u32 %s528_s28, 4  ;;  %s516_s12 = scalar_lea.sflag [#allocation5], %s1154_s30  ;;  %s532_s15 = int_to_ptr.hbm [resolvable:$true] %s531_s15 }
  0x27   : > { %v716_v8 = vld [vmem:[%s1160_s3] sm:$0xff]  ;;  %v718_v9 = vld [vmem:[%s1160_s3 + $0x10] sm:$0xff]  ;;  %v717_v12 = vld [vmem:[%s1160_s3 + $0x8] sm:$0xff]  ;;  %s955_s16 = sshra.s32 %s532_s15, 4  ;;  %s961_s25 = scalar_lea.hbm %s1220_s2, 128  ;;  %s956_s16 = int_to_ptr.hbm [resolvable:$true] %s955_s16 }
  0x28   : > { %v720_v10 = vld [vmem:[%s1160_s3 + $0x20] sm:$0xff]  ;;  %v722_v11 = vld [vmem:[%s1160_s3 + $0x30] sm:$0xff]  ;;  %v719_v13 = vld [vmem:[%s1160_s3 + $0x18] sm:$0xff]  ;;  %s957_s21 = scalar_lea.hbm %s956_s16, 64  ;;  %p962_p10 = scmp.lt.s32.totalorder %s956_s16, %s1220_s2 }
  0x29   : > { %384 = vmatpush.bf16.msra.mxu0 %v730_v1  ;;  %783 = vmatpush.bf16.msra.mxu1 %v730_v1  ;;  %v721_v14 = vld [vmem:[%s1160_s3 + $0x28] sm:$0xff]  ;;  %v723_v15 = vld [vmem:[%s1160_s3 + $0x38] sm:$0xff]  ;;  %p958_p1 = scmp.ne.s32.totalorder %s956_s16, %s957_s21  ;;  %p963_p12 = scmp.lt.s32.totalorder %s961_s25, %s957_s21 }
  0x2a   : > { %784 = vmatpush.bf16.msra.mxu2 %v730_v1  ;;  %785 = vmatpush.bf16.msra.mxu3 %v730_v1 }
  0x2b   : > { %p959_p4 = pnand %p958_p1, %p1131_p5  ;;  %p964_p13 = por %p963_p12, %p962_p10 }
  0x2d   : > { %385 = vmatpush.bf16.msra.mxu0 %v729_v2  ;;  %786 = vmatpush.bf16.msra.mxu1 %v729_v2  ;;  %p960_p8 = pneg %p959_p4 }
  0x2e   : > { %787 = vmatpush.bf16.msra.mxu2 %v729_v2  ;;  %788 = vmatpush.bf16.msra.mxu3 %v729_v2 }
  0x2f   : > { %p965_p0 = pnand %p964_p13, %p960_p8 }
  0x31   : > { %386 = vmatpush.bf16.msra.mxu0 %v728_v3  ;;  %789 = vmatpush.bf16.msra.mxu1 %v728_v3 }
  0x32   : > { %790 = vmatpush.bf16.msra.mxu2 %v728_v3  ;;  %791 = vmatpush.bf16.msra.mxu3 %v728_v3 }
  0x35   : > { %387 = vmatpush.bf16.msra.mxu0 %v727_v4  ;;  %792 = vmatpush.bf16.msra.mxu1 %v727_v4 }
  0x36   : > { %793 = vmatpush.bf16.msra.mxu2 %v727_v4  ;;  %794 = vmatpush.bf16.msra.mxu3 %v727_v4 }
  0x39   : > { %388 = vmatpush.bf16.msra.mxu0 %v726_v5  ;;  %795 = vmatpush.bf16.msra.mxu1 %v726_v5 }
  0x3a   : > { %796 = vmatpush.bf16.msra.mxu2 %v726_v5  ;;  %797 = vmatpush.bf16.msra.mxu3 %v726_v5 }
  0x3d   : > { %389 = vmatpush.bf16.msra.mxu0 %v725_v6  ;;  %798 = vmatpush.bf16.msra.mxu1 %v725_v6 }
  0x3e   : > { %799 = vmatpush.bf16.msra.mxu2 %v725_v6  ;;  %800 = vmatpush.bf16.msra.mxu3 %v725_v6 }
  0x41   : > { %390 = vmatpush.bf16.msra.mxu0 %v724_v7  ;;  %801 = vmatpush.bf16.msra.mxu1 %v724_v7 }
  0x42   : > { %802 = vmatpush.bf16.msra.mxu2 %v724_v7  ;;  %803 = vmatpush.bf16.msra.mxu3 %v724_v7 }
  0x44   : > { %391 = vmatmul.bf16.vlgmr.msra.gmra.mxu0 %v716_v8  ;;  %401 = vmatmul.bf16.vlgmr.msra.gmra.mxu1 %v718_v9 }
  0x45   : > { %411 = vmatmul.bf16.vlgmr.msra.gmra.mxu2 %v720_v10  ;;  %421 = vmatmul.bf16.vlgmr.msra.gmra.mxu3 %v722_v11 }
  0x54   : > { %396 = vmatmul.bf16.gmra.mxu0 %v717_v12  ;;  %406 = vmatmul.bf16.gmra.mxu1 %v719_v13 }
  0x55   : > { %416 = vmatmul.bf16.gmra.mxu2 %v721_v14  ;;  %426 = vmatmul.bf16.gmra.mxu3 %v723_v15 }
  0xc1   : > { %v392_v16 = vpop.f32.mrf.mxu0  ;;  %v402_v17 = vpop.f32.mrf.mxu1 }
  0xc8   : > { %v412_v18 = vpop.f32.mrf.mxu2  ;;  %v422_v19 = vpop.f32.mrf.mxu3 }
  0xc9   : > { %v394_v20 = vpop.f32.mrf.mxu0  ;;  %v404_v21 = vpop.f32.mrf.mxu1 }
  0xca   : > { %v736_v22 = vpack.c.bf16 %v394_v20, %v392_v16  ;;  %v746_v23 = vpack.c.bf16 %v404_v21, %v402_v17 }
  0xcc   : > { %737 = vst [vmem:[%s215_s17] sm:$0xff] %v736_v22  }
  0xcd   : > { %774 = vst [vmem:[%s215_s17 + $0x10] sm:$0xff] %v746_v23  }
  0xd0   : > { %v414_v24 = vpop.f32.mrf.mxu2  ;;  %v424_v25 = vpop.f32.mrf.mxu3 }
  0xd1   : > { %v756_v26 = vpack.c.bf16 %v414_v24, %v412_v18  ;;  %v766_v27 = vpack.c.bf16 %v424_v25, %v422_v19  ;;  %v397_v28 = vpop.f32.mrf.mxu0  ;;  %v407_v29 = vpop.f32.mrf.mxu1 }
  0xd3   : > { %776 = vst [vmem:[%s215_s17 + $0x20] sm:$0xff] %v756_v26  }
  0xd4   : > { %778 = vst [vmem:[%s215_s17 + $0x30] sm:$0xff] %v766_v27  }
  0xd8   : > { %v417_v30 = vpop.f32.mrf.mxu2  ;;  %v427_v31 = vpop.f32.mrf.mxu3 }
  0xd9   : > { %v399_v32 = vpop.f32.mrf.mxu0  ;;  %v409_v33 = vpop.f32.mrf.mxu1 }
  0xda   : > { %v741_v34 = vpack.c.bf16 %v399_v32, %v397_v28  ;;  %v751_v35 = vpack.c.bf16 %v409_v33, %v407_v29 }
  0xdc   : > { %773 = vst [vmem:[%s215_s17 + $0x8] sm:$0xff] %v741_v34  }
  0xdd   : > { %775 = vst [vmem:[%s215_s17 + $0x18] sm:$0xff] %v751_v35  }
  0xe0   : > { %v419_v36 = vpop.f32.mrf.mxu2  ;;  %v429_v37 = vpop.f32.mrf.mxu3 }
  0xe1   : > { %v761_v38 = vpack.c.bf16 %v419_v36, %v417_v30  ;;  %v771_v39 = vpack.c.bf16 %v429_v37, %v427_v31 }
  0xe3   : > { %777 = vst [vmem:[%s215_s17 + $0x28] sm:$0xff] %v761_v38  }
  0xe4   : > { %779 = vst [vmem:[%s215_s17 + $0x38] sm:$0xff] %v771_v39  }
  0xe5   : > { %968 = shalt.err (!%p965_p0)
}
  0xe6   : > { %s1032_s30 = smov 64   ;;  %s1033_s5 = smov 4  }
  0xe7   : > { %810 = dma.vmem_to_hbm [thread:$0]  (%p1131_p5), %s530_s6, 1024, %s532_s15, %s516_s12, %s1032_s30, %s1032_s30, %s1033_s5  }
  0xe8 PF: > { %s546_s7 = sand.u32 1, %s1007_s9   ;;  %p821_p3 = pnand %p638_p11, %p1098_p6 }
  0xe9   : > { %s547_s3 = scalar_lea.sflag [#allocation5], %s546_s7 }
  0xea   : > { %p822_p7 = pneg %p821_p3 }
  0xec   : > { %1002 = dma.done.wait (%p822_p7), %s547_s3, 1024  }
  0xed   : > { %1004 = vsyncadd (%p822_p7), %s547_s3, 4294966272  ;;  %s19_s14 = sadd.s32 1, %s1027_s14   ;;  %s1228_s9 = smov %s1011_s10 }
  0xee   : > { %p16_p9 = scmp.ge.s32.totalorder %s19_s14, 4   ;;  %s1229_s10 = smov %s1015_s11 }
  0xef   : > { %s1230_s11 = smov %s1140_s8  ;;  %s1231_s12 = smov %s1023_s13 }
  0xf0   : > { %s1232_s13 = smov %s1234_s29  ;;  %18 = sbr.rel (!%p16_p9) target bundleno = 7 (0x7), region = 86 }
  0xf5   :  { %553 = vsyncpa [#allocation4], 1 }
  0xf6   :  { %555 = vsyncpa [#allocation4 + $0x1], 1 }
  0xf7   :  { %556 = vsyncpa [#allocation7], 1 }
  0xf8   :  { %557 = vsyncpa [#allocation5], 1 }
  0xf9   :  { %559 = vsyncpa [#allocation5 + $0x1], 1 }

</bundles_post_ra>
